<compile_context>
chip_gen: v6e
topology: v6e:2x2x1
jax: 0.10.0
libtpu: 0.0.40
codegen_flags: <defaults>
</compile_context>

<pallas_src>
import jax
import jax.numpy as jnp
from jax.experimental import pallas as pl
from jax.experimental.pallas import tpu as pltpu


def _round_up(v, m):
    return (v + m - 1) // m * m


def _make_gcn_kernel(tk, resident_xw):
    """Grid = (dst_tile i [parallel], src_tile k [reduction, innermost])."""

    def kernel(a_ref, xw_ref, dinv_ref, b1_ref, p_ref, w2_ref, o_ref, h_acc):
        k = pl.program_id(1)

        @pl.when(k == 0)
        def _():
            h_acc[...] = jnp.zeros_like(h_acc)

        if resident_xw:
            # XW1 is VMEM-resident: slice the k-th src block out of the full array.
            off = pl.multiple_of(k * tk, tk)
            xw = xw_ref[pl.ds(off, tk), :]
        else:
            xw = xw_ref[...]

        # Streamed MXU reduction: h_acc[i] += A[i, k] @ (dinv[src] * X W1)[k].
        h_acc[...] += jnp.dot(a_ref[...], xw, preferred_element_type=jnp.float32)

        @pl.when(k == pl.num_programs(1) - 1)
        def _():
            # dst-side normalization + bias + ReLU on the VPU, then fused
            # mean-pool and final linear (bf16 operands, f32 accumulate).
            h = jnp.maximum(h_acc[...] * dinv_ref[...] + b1_ref[...], 0.0)
            h = h.astype(jnp.bfloat16)
            pooled = jnp.dot(p_ref[...], h, preferred_element_type=jnp.float32)
            out = jnp.dot(pooled.astype(jnp.bfloat16), w2_ref[...],
                          preferred_element_type=jnp.float32)
            o_ref[...] = out[None]

    return kernel


def gcn_for_packing_forward(x, edge_index, batch, w1, b1, w2, b2, batch_size):
    """Plain-JAX glue (dense adjacency / pooling matrix) + tiled Pallas kernel."""
    n, f = x.shape
    hidden = int(w1.shape[1])
    num_classes = int(w2.shape[1])
    c_pad = _round_up(num_classes, 128)        # lane-dense output store

    # ---- tile geometry: lane-dense, (8, 128)-aligned, v7x-friendly split.
    n_pad = _round_up(n, 128)
    tile = 2048 if n_pad >= 8192 else 1024
    if n_pad > tile:
        n_pad = _round_up(n_pad, tile)
        if (n_pad // tile) % 2 == 1 and (n_pad // tile) > 1:
            n_pad += tile                      # even dst-tile count -> 2-TC balance
        tm = tk = tile
    else:
        tk = n_pad
        if n_pad >= 256 and (n_pad // 2) % 128 == 0:
            tm = n_pad // 2                    # gi = 2 for v7x megacore
        else:
            tm = n_pad
    gi = n_pad // tm                           # dst tiles (parallel axis)
    gk = n_pad // tk                           # src tiles (reduction axis)

    src = edge_index[0]
    dst = edge_index[1]

    # O(E) in-degree scatter (matches PyG gcn_norm, add_self_loops=False).
    deg = jnp.zeros((n_pad,), jnp.float32).at[dst].add(1.0)
    dinv = jnp.where(deg > 0.0, jax.lax.rsqrt(jnp.maximum(deg, 1e-12)), 0.0)

    # Dense adjacency A[dst, src], built DIRECTLY in bf16 (edge multiplicities
    # are small integers -> exact in bf16 up to 256).  Single O(N^2) pass.
    a_bf16 = jnp.zeros((n_pad, n_pad), jnp.bfloat16).at[dst, src].add(1.0)

    # X @ W1 computed ONCE (tiny [N, H]); fold the src-side dinv into its rows.
    x_pad = jnp.zeros((n_pad, f), jnp.float32).at[:n].set(x.astype(jnp.float32))
    xw1 = jnp.dot(x_pad, w1.astype(jnp.float32)) * dinv[:, None]
    xw1_bf16 = xw1.astype(jnp.bfloat16)

    # Pooling matrix P[g, i] = 1/|graph g| for real nodes; padded columns = 0.
    # (Empty graph slots -> pooled 0 -> logits = b2, matching scatter-mean.)
    counts = jnp.zeros((batch_size,), jnp.float32).at[batch].add(1.0)
    p = jnp.zeros((batch_size, n_pad), jnp.float32).at[
        batch, jnp.arange(n)].set(1.0)
    p_bf16 = (p / jnp.maximum(counts, 1.0)[:, None]).astype(jnp.bfloat16)

    dinv_col = dinv.reshape(n_pad, 1)
    b1_2d = b1.reshape(1, hidden).astype(jnp.float32)
    w2_pad = jnp.zeros((hidden, c_pad), jnp.float32).at[:, :num_classes].set(
        w2.astype(jnp.float32)).astype(jnp.bfloat16)

    # XW1 residency: DMA'd once if it comfortably fits VMEM, else re-streamed.
    resident_xw = (2 * n_pad * hidden * 2) <= (24 << 20)
    if resident_xw:
        xw_spec = pl.BlockSpec((n_pad, hidden), lambda i, k: (0, 0))
        xw_bytes = n_pad * hidden * 2
    else:
        xw_spec = pl.BlockSpec((tk, hidden), lambda i, k: (k, 0))
        xw_bytes = gi * n_pad * hidden * 2

    # Explicit scoped-VMEM limit (default 16/32 MiB is too small for big tiles).
    vmem_bytes = (2 * tm * tk * 2                                   # A dbl-buffer
                  + (2 * n_pad * hidden * 2 if resident_xw
                     else 2 * tk * hidden * 2)                      # XW1
                  + tm * hidden * 4                                 # h_acc scratch
                  + 2 * batch_size * tm * 2                         # P cols
                  + 2 * hidden * c_pad * 2                          # W2
                  + 2 * batch_size * c_pad * 4                      # out
                  + 2 * tm * 4 + 2 * hidden * 4)                    # dinv, b1
    vmem_limit = int(min(max(2 * vmem_bytes, 32 << 20), 56 << 20))  # <= v7x 64 MiB

    flops = (2 * n_pad * n_pad * hidden
             + gi * (2 * batch_size * tm * hidden
                     + 2 * batch_size * hidden * c_pad))
    bytes_accessed = (n_pad * n_pad * 2                 # A (bf16, streamed)
                      + xw_bytes                        # XW1
                      + batch_size * n_pad * 2          # P (bf16)
                      + n_pad * 4                       # dinv
                      + hidden * c_pad * 2              # W2
                      + gi * batch_size * c_pad * 4)    # partial outputs

    kernel = _make_gcn_kernel(tk, resident_xw)
    partials = pl.pallas_call(
        kernel,
        out_shape=jax.ShapeDtypeStruct((gi, batch_size, c_pad), jnp.float32),
        grid_spec=pltpu.PrefetchScalarGridSpec(
            num_scalar_prefetch=0,
            grid=(gi, gk),
            in_specs=[
                pl.BlockSpec((tm, tk), lambda i, k: (i, k)),              # A
                xw_spec,                                                  # dinv*XW1
                pl.BlockSpec((tm, 1), lambda i, k: (i, 0)),               # dinv(dst)
                pl.BlockSpec((1, hidden), lambda i, k: (0, 0)),           # b1
                pl.BlockSpec((batch_size, tm), lambda i, k: (0, i)),      # P cols
                pl.BlockSpec((hidden, c_pad), lambda i, k: (0, 0)),       # W2 (padded)
            ],
            out_specs=pl.BlockSpec((1, batch_size, c_pad),
                                   lambda i, k: (i, 0, 0)),
            scratch_shapes=[pltpu.VMEM((tm, hidden), jnp.float32)],
        ),
        compiler_params=pltpu.CompilerParams(
            dimension_semantics=("parallel", "arbitrary"),
            vmem_limit_bytes=vmem_limit),
        cost_estimate=pl.CostEstimate(flops=flops, transcendentals=0,
                                      bytes_accessed=bytes_accessed),
    )(a_bf16, xw1_bf16, dinv_col, b1_2d, p_bf16, w2_pad)

    logits = (partials.sum(axis=0)[:, :num_classes]
              + b2.reshape(1, num_classes).astype(jnp.float32))
    return logits


def _reference_forward(x, edge_index, batch, w1, b1, w2, b2, batch_size):
    """Plain-JAX f32 reference of the same eval-mode forward."""
    n = x.shape[0]
    src, dst = edge_index[0], edge_index[1]
    a = jnp.zeros((n, n), jnp.float32).at[dst, src].add(1.0)
    deg = a.sum(axis=1)
    dinv = jnp.where(deg > 0.0, 1.0 / jnp.sqrt(jnp.maximum(deg, 1e-12)), 0.0)
    a_norm = dinv[:, None] * a * dinv[None, :]
    h = jnp.maximum(a_norm @ (x @ w1) + b1, 0.0)
    counts = jnp.zeros((batch_size,), jnp.float32).at[batch].add(1.0)
    p = jnp.zeros((batch_size, n), jnp.float32).at[batch, jnp.arange(n)].set(1.0)
    p = p / jnp.maximum(counts, 1.0)[:, None]
    return (p @ h) @ w2 + b2


if __name__ == "__main__":
    # Small synthetic shapes consistent with the module.
    N_NODES = 32          # total nodes in the packed batch
    NUM_FEATURES = 8      # dataset.num_node_features
    HIDDEN = 32           # hidden_channels
    NUM_CLASSES = 6       # dataset.num_classes
    BATCH_SIZE = 4        # batch_size (graph slots, incl. possible padding graph)
    NUM_EDGES = 96

    key = jax.random.PRNGKey(0)
    kx, ke1, ke2, kb, kw1, kb1, kw2, kb2, ky = jax.random.split(key, 9)

    x = jax.random.normal(kx, (N_NODES, NUM_FEATURES), jnp.float32)
    src = jax.random.randint(ke1, (NUM_EDGES,), 0, N_NODES)
    dst = jax.random.randint(ke2, (NUM_EDGES,), 0, N_NODES)
    edge_index = jnp.stack([src, dst], axis=0)                           # [2, E]
    batch = jnp.sort(jax.random.randint(kb, (N_NODES,), 0, BATCH_SIZE))  # [N]

    # Deterministic parameter init (shapes from GCNConv / Linear in __init__).
    w1 = jax.random.normal(kw1, (NUM_FEATURES, HIDDEN), jnp.float32) * 0.1
    b1 = jax.random.normal(kb1, (HIDDEN,), jnp.float32) * 0.01
    w2 = jax.random.normal(kw2, (HIDDEN, NUM_CLASSES), jnp.float32) * 0.1
    b2 = jax.random.normal(kb2, (NUM_CLASSES,), jnp.float32) * 0.01

    # graphs_mask / y only affect the training-loss branch; unused in eval output.
    graphs_mask = jnp.array([True, True, True, False])
    y = jax.random.randint(ky, (BATCH_SIZE,), 0, NUM_CLASSES)

    logits = gcn_for_packing_forward(x, edge_index, batch, w1, b1, w2, b2,
                                     BATCH_SIZE)
    jax.block_until_ready(logits)
    assert logits.shape == (BATCH_SIZE, NUM_CLASSES)

    ref = _reference_forward(x, edge_index, batch, w1, b1, w2, b2, BATCH_SIZE)
    max_err = float(jnp.max(jnp.abs(logits - ref)))
    assert max_err < 5e-2, f"max abs err vs f32 reference: {max_err}"

    print("KERNEL_OK")
</pallas_src>

<mosaic_0001>
module attributes {stable_mosaic.version = 11 : i64} {
  func.func @kernel(%arg0: i32, %arg1: i32, %arg2: memref<128x128xbf16, #tpu.memory_space<vmem>>, %arg3: memref<128x32xbf16, #tpu.memory_space<vmem>>, %arg4: memref<128x1xf32, #tpu.memory_space<vmem>>, %arg5: memref<1x32xf32, #tpu.memory_space<vmem>>, %arg6: memref<4x128xbf16, #tpu.memory_space<vmem>>, %arg7: memref<32x128xbf16, #tpu.memory_space<vmem>>, %arg8: memref<1x4x128xf32, #tpu.memory_space<vmem>>, %arg9: memref<128x32xf32, #tpu.memory_space<vmem>>) attributes {dimension_semantics = [#tpu.dimension_semantics<parallel>, #tpu.dimension_semantics<arbitrary>], iteration_bounds = array<i64: 1, 1>, scalar_prefetch = 0 : i64, scratch_operands = 1 : i64, tpu.core_type = #tpu.core_type<tc>, window_params = [{transform_indices = @transform_0, window_bounds = array<i64: 128, 128>}, {pipeline_mode = #tpu.pipeline_mode<synchronous>, transform_indices = @transform_1, window_bounds = array<i64: 128, 32>}, {transform_indices = @transform_2, window_bounds = array<i64: 128, 1>}, {pipeline_mode = #tpu.pipeline_mode<synchronous>, transform_indices = @transform_3, window_bounds = array<i64: 1, 32>}, {transform_indices = @transform_4, window_bounds = array<i64: 4, 128>}, {pipeline_mode = #tpu.pipeline_mode<synchronous>, transform_indices = @transform_5, window_bounds = array<i64: 32, 128>}, {transform_indices = @transform_6, window_bounds = array<i64: 1, 4, 128>}]} {
    %c0_i32 = arith.constant 0 : i32
    %0 = arith.cmpi eq, %arg1, %c0_i32 : i32
    %1 = arith.extui %0 : i1 to i32
    %c0_i32_0 = arith.constant 0 : i32
    %2 = arith.cmpi ne, %1, %c0_i32_0 : i32
    scf.if %2 {
      %cst_9 = arith.constant 0.000000e+00 : f32
      %15 = vector.broadcast %cst_9 : f32 to vector<128x32xf32>
      %c0_10 = arith.constant 0 : index
      %c0_11 = arith.constant 0 : index
      %16 = vector.load %arg9[%c0_10, %c0_11] : memref<128x32xf32, #tpu.memory_space<vmem>>, vector<128x32xf32>
      tpu.vector_store %arg9[%c0_10, %c0_11], %15 {strides = array<i32>} : memref<128x32xf32, #tpu.memory_space<vmem>>, vector<128x32xf32>,
    } else {
    }
    %c128_i32 = arith.constant 128 : i32
    %3 = arith.muli %arg1, %c128_i32 : i32
    %4 = tpu.assume_multiple %3, 128 : i32
    %5 = arith.index_cast %4 : i32 to index
    %c0 = arith.constant 0 : index
    %6 = vector.load %arg3[%5, %c0] : memref<128x32xbf16, #tpu.memory_space<vmem>>, vector<128x32xbf16>
    %c0_1 = arith.constant 0 : index
    %c0_2 = arith.constant 0 : index
    %7 = vector.load %arg9[%c0_1, %c0_2] : memref<128x32xf32, #tpu.memory_space<vmem>>, vector<128x32xf32>
    %c0_3 = arith.constant 0 : index
    %c0_4 = arith.constant 0 : index
    %8 = vector.load %arg2[%c0_3, %c0_4] : memref<128x128xbf16, #tpu.memory_space<vmem>>, vector<128x128xbf16>
    %cst = arith.constant dense<0.000000e+00> : vector<128x32xf32>
    %9 = tpu.matmul %8, %6, %cst {dimension_numbers = #tpu.dot_dimension_numbers<[1], [0], [0], [1], [0, 0, 1, 1], [], []>} : vector<128x128xbf16>, vector<128x32xbf16>, vector<128x32xf32> -> vector<128x32xf32>
    %10 = arith.addf %7, %9 : vector<128x32xf32>
    %c0_5 = arith.constant 0 : index
    %c0_6 = arith.constant 0 : index
    %11 = vector.load %arg9[%c0_5, %c0_6] : memref<128x32xf32, #tpu.memory_space<vmem>>, vector<128x32xf32>
    tpu.vector_store %arg9[%c0_5, %c0_6], %10 {strides = array<i32>} : memref<128x32xf32, #tpu.memory_space<vmem>>, vector<128x32xf32>,
    %c0_i32_7 = arith.constant 0 : i32
    %12 = arith.cmpi eq, %arg1, %c0_i32_7 : i32
    %13 = arith.extui %12 : i1 to i32
    %c0_i32_8 = arith.constant 0 : i32
    %14 = arith.cmpi ne, %13, %c0_i32_8 : i32
    scf.if %14 {
      %c0_9 = arith.constant 0 : index
      %c0_10 = arith.constant 0 : index
      %15 = vector.load %arg9[%c0_9, %c0_10] : memref<128x32xf32, #tpu.memory_space<vmem>>, vector<128x32xf32>
      %c0_11 = arith.constant 0 : index
      %c0_12 = arith.constant 0 : index
      %16 = vector.load %arg4[%c0_11, %c0_12] : memref<128x1xf32, #tpu.memory_space<vmem>>, vector<128x1xf32>
      %17 = vector.broadcast %16 : vector<128x1xf32> to vector<128x32xf32>
      %18 = arith.mulf %15, %17 : vector<128x32xf32>
      %c0_13 = arith.constant 0 : index
      %c0_14 = arith.constant 0 : index
      %19 = vector.load %arg5[%c0_13, %c0_14] : memref<1x32xf32, #tpu.memory_space<vmem>>, vector<1x32xf32>
      %20 = vector.broadcast %19 : vector<1x32xf32> to vector<128x32xf32>
      %21 = arith.addf %18, %20 : vector<128x32xf32>
      %cst_15 = arith.constant 0.000000e+00 : f32
      %22 = vector.broadcast %cst_15 : f32 to vector<128x32xf32>
      %23 = arith.maximumf %21, %22 : vector<128x32xf32>
      %24 = arith.truncf %23 : vector<128x32xf32> to vector<128x32xbf16>
      %c0_16 = arith.constant 0 : index
      %c0_17 = arith.constant 0 : index
      %25 = vector.load %arg6[%c0_16, %c0_17] : memref<4x128xbf16, #tpu.memory_space<vmem>>, vector<4x128xbf16>
      %cst_18 = arith.constant dense<0.000000e+00> : vector<4x32xf32>
      %26 = tpu.matmul %25, %24, %cst_18 {dimension_numbers = #tpu.dot_dimension_numbers<[1], [0], [0], [1], [0, 0, 1, 1], [], []>} : vector<4x128xbf16>, vector<128x32xbf16>, vector<4x32xf32> -> vector<4x32xf32>
      %27 = arith.truncf %26 : vector<4x32xf32> to vector<4x32xbf16>
      %c0_19 = arith.constant 0 : index
      %c0_20 = arith.constant 0 : index
      %28 = vector.load %arg7[%c0_19, %c0_20] : memref<32x128xbf16, #tpu.memory_space<vmem>>, vector<32x128xbf16>
      %cst_21 = arith.constant dense<0.000000e+00> : vector<4x128xf32>
      %29 = tpu.matmul %27, %28, %cst_21 {dimension_numbers = #tpu.dot_dimension_numbers<[1], [0], [0], [1], [0, 0, 1, 1], [], []>} : vector<4x32xbf16>, vector<32x128xbf16>, vector<4x128xf32> -> vector<4x128xf32>
      %30 = vector.shape_cast %29 : vector<4x128xf32> to vector<1x4x128xf32>
      %c0_22 = arith.constant 0 : index
      %c0_23 = arith.constant 0 : index
      %c0_24 = arith.constant 0 : index
      %31 = vector.load %arg8[%c0_22, %c0_23, %c0_24] : memref<1x4x128xf32, #tpu.memory_space<vmem>>, vector<1x4x128xf32>
      tpu.vector_store %arg8[%c0_22, %c0_23, %c0_24], %30 {strides = array<i32>} : memref<1x4x128xf32, #tpu.memory_space<vmem>>, vector<1x4x128xf32>,
    } else {
    }
    return
  }
  func.func @transform_0(%arg0: i32, %arg1: i32) -> (i32, i32) {
    %c0_i32 = arith.constant 0 : i32
    return %arg0, %arg1 : i32, i32
  }
  func.func @transform_1(%arg0: i32, %arg1: i32) -> (i32, i32) {
    %c0_i32 = arith.constant 0 : i32
    %c0_i32_0 = arith.constant 0 : i32
    %c0_i32_1 = arith.constant 0 : i32
    return %c0_i32, %c0_i32_0 : i32, i32
  }
  func.func @transform_2(%arg0: i32, %arg1: i32) -> (i32, i32) {
    %c0_i32 = arith.constant 0 : i32
    %c0_i32_0 = arith.constant 0 : i32
    return %arg0, %c0_i32 : i32, i32
  }
  func.func @transform_3(%arg0: i32, %arg1: i32) -> (i32, i32) {
    %c0_i32 = arith.constant 0 : i32
    %c0_i32_0 = arith.constant 0 : i32
    %c0_i32_1 = arith.constant 0 : i32
    return %c0_i32, %c0_i32_0 : i32, i32
  }
  func.func @transform_4(%arg0: i32, %arg1: i32) -> (i32, i32) {
    %c0_i32 = arith.constant 0 : i32
    %c0_i32_0 = arith.constant 0 : i32
    return %c0_i32, %arg0 : i32, i32
  }
  func.func @transform_5(%arg0: i32, %arg1: i32) -> (i32, i32) {
    %c0_i32 = arith.constant 0 : i32
    %c0_i32_0 = arith.constant 0 : i32
    %c0_i32_1 = arith.constant 0 : i32
    return %c0_i32, %c0_i32_0 : i32, i32
  }
  func.func @transform_6(%arg0: i32, %arg1: i32) -> (i32, i32, i32) {
    %c0_i32 = arith.constant 0 : i32
    %c0_i32_0 = arith.constant 0 : i32
    %c0_i32_1 = arith.constant 0 : i32
    return %arg0, %c0_i32, %c0_i32_0 : i32, i32, i32
  }
}

</mosaic_0001>

<bundles_post_ra>
// kernel: tpu_custom_call.1
= control target key start
LH: loop header
LB: loop body
LE: loop exit
PB: predicated region body
PF: predicated region fallthrough
CT: control target
= control target key end

     0   :  { %v775_v2 = vmov 0   ;;  %s1006_s0 = inlined_call_operand.vmem [shape: bf16[128,128], index: 0, kind: input, shape index: {}]   ;;  %s1007_s1 = inlined_call_operand.vmem [shape: bf16[128,32], index: 1, kind: input, shape index: {}]   ;;  %s1008_s2 = inlined_call_operand.vmem [shape: f32[128,1], index: 2, kind: input, shape index: {}]   ;;  %s1009_s3 = inlined_call_operand.vmem [shape: f32[1,32], index: 3, kind: input, shape index: {}]   ;;  %s1010_s4 = inlined_call_operand.vmem [shape: bf16[4,128], index: 4, kind: input, shape index: {}]   ;;  %s1011_s5 = inlined_call_operand.vmem [shape: bf16[32,128], index: 5, kind: input, shape index: {}]   ;;  %s1012_s6 = inlined_call_operand.hbm [shape: f32[1,4,128], index: 6, kind: output, shape index: {}]  }
   0x1   :  { %v735_v0 = vld [vmem:[%s1007_s1 + $0x38] sm:$0xff]   ;;  %v736_v1 = vld [vmem:[%s1007_s1 + $0x30] sm:$0xff]   ;;  %733 = vset.pattern.permute.xlu0 %v775_v2  ;;  %734 = vset.pattern.permute.xlu1 %v775_v2  ;;  %v737_v3 = vld [vmem:[%s1007_s1 + $0x28] sm:$0xff]  }
   0x2   :  { %669 = vmatprep.subr.bf16.mxu0 %v735_v0  ;;  %v738_v4 = vld [vmem:[%s1007_s1 + $0x20] sm:$0xff]   ;;  %v739_v6 = vld [vmem:[%s1007_s1 + $0x18] sm:$0xff]   ;;  %v740_v7 = vld [vmem:[%s1007_s1 + $0x10] sm:$0xff]  }
   0x3   :  { %670 = vmatpush3.bf16.msra.mxu0 %v735_v0  ;;  %v743_v5 = vld [vmem:[%s1006_s0] sm:$0xff]   ;;  %v358_v8 = vld [vmem:[%s1008_s2 + $0x70] sm:$0xff]  ;;  %v359_v10 = vld [vmem:[%s1008_s2 + $0x78] sm:$0xff] }
   0x4   :  { %671 = vmatprep.subr.bf16.mxu0 %v736_v1  ;;  %685 = vmatprep.mubr.bf16.mxu0 %v743_v5  ;;  %v356_v9 = vld [vmem:[%s1008_s2 + $0x60] sm:$0xff]  ;;  %v357_v11 = vld [vmem:[%s1008_s2 + $0x68] sm:$0xff]  ;;  %v354_v13 = vld [vmem:[%s1008_s2 + $0x50] sm:$0xff] }
   0x5   :  { %432 = vperm.xlu0 %733, %v358_v8   ;;  %422 = vperm.xlu1 %734, %v356_v9   ;;  %v741_v12 = vld [vmem:[%s1007_s1 + $0x8] sm:$0xff]   ;;  %v355_v14 = vld [vmem:[%s1008_s2 + $0x58] sm:$0xff] }
   0x7   :  { %672 = vmatpush3.bf16.msra.mxu0 %v736_v1 }
   0x8   :  { %673 = vmatprep.subr.bf16.mxu0 %v737_v3 }
   0x9   :  { %437 = vperm.xlu0 %733, %v359_v10   ;;  %427 = vperm.xlu1 %734, %v357_v11  }
   0xb   :  { %674 = vmatpush3.bf16.msra.mxu0 %v737_v3 }
   0xc   :  { %675 = vmatprep.subr.bf16.mxu0 %v738_v4 }
   0xf   :  { %676 = vmatpush3.bf16.msra.mxu0 %v738_v4 }
  0x10   :  { %677 = vmatprep.subr.bf16.mxu0 %v739_v6 }
  0x13   :  { %678 = vmatpush3.bf16.msra.mxu0 %v739_v6 }
  0x14   :  { %679 = vmatprep.subr.bf16.mxu0 %v740_v7 }
  0x15   :  { %11 = vsyncpa [#allocation4], 0  ;;  %v742_v15 = vld [vmem:[%s1007_s1] sm:$0xff]   ;;  %412 = vperm.xlu0 %733, %v354_v13   ;;  %417 = vperm.xlu1 %734, %v355_v14   ;;  %v353_v17 = vld [vmem:[%s1008_s2 + $0x48] sm:$0xff]  ;;  %vm29_vm0 = vcmask 261120   ;;  %v776_v18 = vmov 0.0  }
  0x16   :  { %v352_v16 = vld [vmem:[%s1008_s2 + $0x40] sm:$0xff]  ;;  %32 = vst.msk [vmem:[#allocation2 + $0x10] sm:$0xff] %vm29_vm0, %v776_v18  ;;  %30 = vst.msk [vmem:[#allocation2] sm:$0xff] %vm29_vm0, %v776_v18  ;;  %v744_v19 = vld [vmem:[%s1006_s0 + $0x8] sm:$0xff]   ;;  %701 = vmatprep.subr.bf16.mxu1 %v776_v18  ;;  %vm777_vm1 = vmmov 0  }
  0x17   :  { %680 = vmatpush3.bf16.msra.mxu0 %v740_v7  ;;  %31 = vst.msk [vmem:[#allocation2 + $0x8] sm:$0xff] %vm29_vm0, %v776_v18  ;;  %33 = vst.msk [vmem:[#allocation2 + $0x18] sm:$0xff] %vm29_vm0, %v776_v18  ;;  %v350_v20 = vld [vmem:[%s1008_s2 + $0x30] sm:$0xff]  ;;  %v351_v21 = vld [vmem:[%s1008_s2 + $0x38] sm:$0xff]  ;;  %717 = vmatprep.mubr.msk.bf16.mxu1 %vm777_vm1, %v776_v18 }
  0x18   :  { %681 = vmatprep.subr.bf16.mxu0 %v741_v12  ;;  %34 = vst.msk [vmem:[#allocation2 + $0x20] sm:$0xff] %vm29_vm0, %v776_v18  ;;  %35 = vst.msk [vmem:[#allocation2 + $0x28] sm:$0xff] %vm29_vm0, %v776_v18  ;;  %v745_v22 = vld [vmem:[%s1006_s0 + $0x10] sm:$0xff]   ;;  %v348_v23 = vld [vmem:[%s1008_s2 + $0x20] sm:$0xff] }
  0x19   :  { %402 = vperm.xlu0 %733, %v352_v16   ;;  %407 = vperm.xlu1 %734, %v353_v17   ;;  %36 = vst.msk [vmem:[#allocation2 + $0x30] sm:$0xff] %vm29_vm0, %v776_v18  ;;  %37 = vst.msk [vmem:[#allocation2 + $0x38] sm:$0xff] %vm29_vm0, %v776_v18  ;;  %v349_v24 = vld [vmem:[%s1008_s2 + $0x28] sm:$0xff]  ;;  %v746_v25 = vld [vmem:[%s1006_s0 + $0x18] sm:$0xff]  }
  0x1a   :  { %38 = vst.msk [vmem:[#allocation2 + $0x40] sm:$0xff] %vm29_vm0, %v776_v18  ;;  %39 = vst.msk [vmem:[#allocation2 + $0x48] sm:$0xff] %vm29_vm0, %v776_v18  ;;  %v346_v26 = vld [vmem:[%s1008_s2 + $0x10] sm:$0xff]  ;;  %v347_v27 = vld [vmem:[%s1008_s2 + $0x18] sm:$0xff] }
  0x1b   :  { %682 = vmatpush3.bf16.msra.mxu0 %v741_v12  ;;  %40 = vst.msk [vmem:[#allocation2 + $0x50] sm:$0xff] %vm29_vm0, %v776_v18  ;;  %41 = vst.msk [vmem:[#allocation2 + $0x58] sm:$0xff] %vm29_vm0, %v776_v18  ;;  %v747_v28 = vld [vmem:[%s1006_s0 + $0x20] sm:$0xff]   ;;  %v345_v30 = vld [vmem:[%s1008_s2 + $0x8] sm:$0xff] }
  0x1c   :  { %683 = vmatprep.subr.bf16.mxu0 %v742_v15  ;;  %42 = vst.msk [vmem:[#allocation2 + $0x60] sm:$0xff] %vm29_vm0, %v776_v18  ;;  %43 = vst.msk [vmem:[#allocation2 + $0x68] sm:$0xff] %vm29_vm0, %v776_v18  ;;  %v344_v29 = vld [vmem:[%s1008_s2] sm:$0xff]  ;;  %v748_v31 = vld [vmem:[%s1006_s0 + $0x28] sm:$0xff]  }
  0x1d   :  { %44 = vst.msk [vmem:[#allocation2 + $0x70] sm:$0xff] %vm29_vm0, %v776_v18  ;;  %45 = vst.msk [vmem:[#allocation2 + $0x78] sm:$0xff] %vm29_vm0, %v776_v18  ;;  %392 = vperm.xlu0 %733, %v350_v20   ;;  %397 = vperm.xlu1 %734, %v351_v21   ;;  %v749_v32 = vld [vmem:[%s1006_s0 + $0x30] sm:$0xff]   ;;  %v750_v33 = vld [vmem:[%s1006_s0 + $0x38] sm:$0xff]  }
  0x1e   :  { %v69_v34 = vld [vmem:[#allocation2 + $0x10] sm:$0xff]  ;;  %v67_v36 = vld [vmem:[#allocation2] sm:$0xff]  ;;  %v70_v39 = vld [vmem:[#allocation2 + $0x18] sm:$0xff] }
  0x1f   :  { %684 = vmatpush3.bf16.msra.mxu0 %v742_v15  ;;  %v68_v42 = vld [vmem:[#allocation2 + $0x8] sm:$0xff]  ;;  %v71_v48 = vld [vmem:[#allocation2 + $0x20] sm:$0xff] }
  0x20   :  { %v73_v45 = vld [vmem:[#allocation2 + $0x30] sm:$0xff]  ;;  %v74_v51 = vld [vmem:[#allocation2 + $0x38] sm:$0xff]  ;;  %v72_v54 = vld [vmem:[#allocation2 + $0x28] sm:$0xff] }
  0x21   :  { %382 = vperm.xlu0 %733, %v348_v23   ;;  %387 = vperm.xlu1 %734, %v349_v24   ;;  %v75_v61 = vld [vmem:[#allocation2 + $0x40] sm:$0xff]  ;;  %v76_v4 = vld [vmem:[#allocation2 + $0x48] sm:$0xff] }
  0x22   :  { %686 = vmatmul.mubr.bf16.vlgmr.msra.gmra.mxu0 %v744_v19  ;;  %v77_v57 = vld [vmem:[#allocation2 + $0x50] sm:$0xff]  ;;  %v78_v1 = vld [vmem:[#allocation2 + $0x58] sm:$0xff] }
  0x23   :  { %689 = vmatprep.mubr.bf16.mxu0 %v745_v22  ;;  %v79_v12 = vld [vmem:[#allocation2 + $0x60] sm:$0xff]  ;;  %v80_v20 = vld [vmem:[#allocation2 + $0x68] sm:$0xff] }
  0x24   :  { %v81_v8 = vld [vmem:[#allocation2 + $0x70] sm:$0xff]  ;;  %v82_v15 = vld [vmem:[#allocation2 + $0x78] sm:$0xff] }
  0x25   :  { %372 = vperm.xlu0 %733, %v346_v26   ;;  %377 = vperm.xlu1 %734, %v347_v27  }
  0x29   :  { %362 = vperm.xlu0 %733, %v344_v29   ;;  %367 = vperm.xlu1 %734, %v345_v30   ;;  %v964_v30 = vld [vmem:[%s1009_s3] ss:$0 sm:$0xff] }
  0x2a   :  { %690 = vmatmul.mubr.bf16.gmra.mxu0 %v746_v25 }
  0x2b   :  { %693 = vmatprep.mubr.bf16.mxu0 %v747_v28 }
  0x32   :  { %694 = vmatmul.mubr.bf16.gmra.mxu0 %v748_v31 }
  0x33   :  { %697 = vmatprep.mubr.bf16.mxu0 %v749_v32 }
  0x3a   :  { %698 = vmatmul.mubr.bf16.gmra.mxu0 %v750_v33 }
  0x80   :  { %v423_v59 = vpop.permute.xlu1 %422  ;;  %v433_v63 = vpop.permute.xlu0 %432 }
  0x84   :  { %v428_v6 = vpop.permute.xlu1 %427  ;;  %v438_v10 = vpop.permute.xlu0 %437 }
  0x90   :  { %v418_v17 = vpop.permute.xlu1 %417  ;;  %v413_v22 = vpop.permute.xlu0 %412 }
  0x94   :  { %v408_v25 = vpop.permute.xlu1 %407  ;;  %v403_v28 = vpop.permute.xlu0 %402 }
  0xe2   :  { %v687_v35 = vpop.f32.mrf.mxu0 }
  0xe3   :  { %v294_v37 = vadd.f32 %v687_v35, %v69_v34 }
  0xe4   :  { %v229_v38 = vpop.f32.mrf.mxu0 }
  0xe5   :  { %311 = vst.msk [vmem:[#allocation2 + $0x10] sm:$0xff] %vm29_vm0, %v294_v37  ;;  %v292_v40 = vadd.f32 %v229_v38, %v67_v36  ;;  %v398_v37 = vpop.permute.xlu1 %397 }
  0xe6   :  { %v688_v41 = vpop.f32.mrf.mxu0 }
  0xe7   :  { %309 = vst.msk [vmem:[#allocation2] sm:$0xff] %vm29_vm0, %v292_v40  ;;  %v295_v43 = vadd.f32 %v688_v41, %v70_v39 }
  0xe8   :  { %v232_v44 = vpop.f32.mrf.mxu0 }
  0xe9   :  { %312 = vst.msk [vmem:[#allocation2 + $0x18] sm:$0xff] %vm29_vm0, %v295_v43  ;;  %v293_v46 = vadd.f32 %v232_v44, %v68_v42  ;;  %v393_v42 = vpop.permute.xlu0 %392 }
  0xea   :  { %v691_v47 = vpop.f32.mrf.mxu0 }
  0xeb   :  { %310 = vst.msk [vmem:[#allocation2 + $0x8] sm:$0xff] %vm29_vm0, %v293_v46  ;;  %v298_v49 = vadd.f32 %v691_v47, %v73_v45 }
  0xec   :  { %v245_v50 = vpop.f32.mrf.mxu0 }
  0xed   :  { %315 = vst.msk [vmem:[#allocation2 + $0x30] sm:$0xff] %vm29_vm0, %v298_v49  ;;  %v296_v52 = vadd.f32 %v245_v50, %v71_v48 }
  0xee   :  { %v692_v53 = vpop.f32.mrf.mxu0 }
  0xef   :  { %313 = vst.msk [vmem:[#allocation2 + $0x20] sm:$0xff] %vm29_vm0, %v296_v52  ;;  %v299_v55 = vadd.f32 %v692_v53, %v74_v51 }
  0xf0   :  { %v248_v56 = vpop.f32.mrf.mxu0 }
  0xf1   :  { %316 = vst.msk [vmem:[#allocation2 + $0x38] sm:$0xff] %vm29_vm0, %v299_v55  ;;  %v297_v58 = vadd.f32 %v248_v56, %v72_v54  ;;  %v388_v54 = vpop.permute.xlu1 %387 }
  0xf2   :  { %v695_v60 = vpop.f32.mrf.mxu0 }
  0xf3   :  { %314 = vst.msk [vmem:[#allocation2 + $0x28] sm:$0xff] %vm29_vm0, %v297_v58  ;;  %v302_v62 = vadd.f32 %v695_v60, %v77_v57 }
  0xf4   :  { %v261_v0 = vpop.f32.mrf.mxu0  ;;  %v334_v60 = vld [vmem:[#allocation2 + $0x30] sm:$0xff] }
  0xf5   :  { %319 = vst.msk [vmem:[#allocation2 + $0x50] sm:$0xff] %vm29_vm0, %v302_v62  ;;  %v300_v2 = vadd.f32 %v261_v0, %v75_v61 }
  0xf6   :  { %v696_v3 = vpop.f32.mrf.mxu0 }
  0xf7   :  { %317 = vst.msk [vmem:[#allocation2 + $0x40] sm:$0xff] %vm29_vm0, %v300_v2  ;;  %v303_v5 = vadd.f32 %v696_v3, %v78_v1 }
  0xf8   :  { %v264_v7 = vpop.f32.mrf.mxu0  ;;  %v335_v55 = vld [vmem:[#allocation2 + $0x38] sm:$0xff] }
  0xf9   :  { %320 = vst.msk [vmem:[#allocation2 + $0x58] sm:$0xff] %vm29_vm0, %v303_v5  ;;  %v301_v9 = vadd.f32 %v264_v7, %v76_v4  ;;  %v447_v0 = vmul.f32 %v398_v37, %v335_v55  ;;  %v446_v4 = vmul.f32 %v393_v42, %v334_v60  ;;  %v378_v5 = vpop.permute.xlu1 %377 }
  0xfa   :  { %v699_v11 = vpop.f32.mrf.mxu0  ;;  %v333_v1 = vld [vmem:[#allocation2 + $0x28] sm:$0xff] }
  0xfb   :  { %318 = vst.msk [vmem:[#allocation2 + $0x48] sm:$0xff] %vm29_vm0, %v301_v9  ;;  %v306_v13 = vadd.f32 %v699_v11, %v81_v8  ;;  %v470_v9 = vadd.f32 %v964_v30, %v447_v0 }
  0xfc   :  { %v277_v14 = vpop.f32.mrf.mxu0  ;;  %v338_v36 = vld [vmem:[#allocation2 + $0x50] sm:$0xff] }
  0xfd   :  { %323 = vst.msk [vmem:[#allocation2 + $0x70] sm:$0xff] %vm29_vm0, %v306_v13  ;;  %v304_v16 = vadd.f32 %v277_v14, %v79_v12  ;;  %v450_v43 = vmul.f32 %v413_v22, %v338_v36  ;;  %v331_v12 = vld [vmem:[#allocation2 + $0x18] sm:$0xff]  ;;  %v469_v14 = vadd.f32 %v964_v30, %v446_v4  ;;  %v368_v22 = vpop.permute.xlu1 %367 }
  0xfe   :  { %v700_v19 = vpop.f32.mrf.mxu0  ;;  %v336_v49 = vld [vmem:[#allocation2 + $0x40] sm:$0xff] }
  0xff   :  { %321 = vst.msk [vmem:[#allocation2 + $0x60] sm:$0xff] %vm29_vm0, %v304_v16  ;;  %v307_v21 = vadd.f32 %v700_v19, %v82_v15  ;;  %v473_v57 = vadd.f32 %v964_v30, %v450_v43  ;;  %v448_v58 = vmul.f32 %v403_v28, %v336_v49  ;;  %v330_v16 = vld [vmem:[#allocation2 + $0x10] sm:$0xff]  ;;  %v328_v28 = vld [vmem:[#allocation2] sm:$0xff] }
 0x100   :  { %v280_v23 = vpop.f32.mrf.mxu0  ;;  %v339_v32 = vld [vmem:[#allocation2 + $0x58] sm:$0xff] }
 0x101   :  { %324 = vst.msk [vmem:[#allocation2 + $0x78] sm:$0xff] %vm29_vm0, %v307_v21  ;;  %v305_v24 = vadd.f32 %v280_v23, %v80_v20  ;;  %v451_v41 = vmul.f32 %v418_v17, %v339_v32  ;;  %v489_v2 = vmax.f32 %v473_v57, 0.0  ;;  %v471_v3 = vadd.f32 %v964_v30, %v448_v58  ;;  %v329_v23 = vld [vmem:[#allocation2 + $0x8] sm:$0xff] }
 0x102   :  { %v337_v44 = vld [vmem:[#allocation2 + $0x48] sm:$0xff]  ;;  %v443_v17 = vmul.f32 %v378_v5, %v331_v12  ;;  %v486_v20 = vmax.f32 %v470_v9, 0.0 }
 0x103   :  { %322 = vst.msk [vmem:[#allocation2 + $0x68] sm:$0xff] %vm29_vm0, %v305_v24  ;;  %v474_v52 = vadd.f32 %v964_v30, %v451_v41  ;;  %v449_v53 = vmul.f32 %v408_v25, %v337_v44  ;;  %v487_v13 = vmax.f32 %v471_v3, 0.0  ;;  %v485_v25 = vmax.f32 %v469_v14, 0.0 }
 0x104   :  { %v342_v26 = vld [vmem:[#allocation2 + $0x70] sm:$0xff] }
 0x105   :  { %v454_v27 = vmul.f32 %v433_v63, %v342_v26  ;;  %v490_v62 = vmax.f32 %v474_v52, 0.0  ;;  %v472_v63 = vadd.f32 %v964_v30, %v449_v53  ;;  %v498_v32 = vpack.c.bf16 %v486_v20, %v485_v25 }
 0x106   :  { %v340_v29 = vld [vmem:[#allocation2 + $0x60] sm:$0xff] }
 0x107   :  { %v477_v34 = vadd.f32 %v964_v30, %v454_v27  ;;  %v452_v35 = vmul.f32 %v423_v59, %v340_v29  ;;  %v383_v59 = vpop.permute.xlu0 %382  ;;  %v500_v7 = vpack.c.bf16 %v490_v62, %v489_v2  ;;  %v488_v8 = vmax.f32 %v472_v63, 0.0 }
 0x108   :  { %v343_v31 = vld [vmem:[#allocation2 + $0x78] sm:$0xff]  ;;  %v466_v29 = vadd.f32 %v964_v30, %v443_v17 }
 0x109   :  { %v455_v33 = vmul.f32 %v438_v10, %v343_v31  ;;  %v493_v45 = vmax.f32 %v477_v34, 0.0  ;;  %v475_v47 = vadd.f32 %v964_v30, %v452_v35  ;;  %v445_v10 = vmul.f32 %v388_v54, %v333_v1 }
 0x10a   :  { %v341_v38 = vld [vmem:[#allocation2 + $0x68] sm:$0xff]  ;;  %v499_v19 = vpack.c.bf16 %v488_v8, %v487_v13  ;;  %v441_v31 = vmul.f32 %v368_v22, %v329_v23  ;;  %v482_v37 = vmax.f32 %v466_v29, 0.0 }
 0x10b   :  { %v478_v39 = vadd.f32 %v964_v30, %v455_v33  ;;  %v453_v40 = vmul.f32 %v428_v6, %v341_v38  ;;  %v491_v56 = vmax.f32 %v475_v47, 0.0  ;;  %v332_v6 = vld [vmem:[#allocation2 + $0x20] sm:$0xff]  ;;  %v373_v11 = vpop.permute.xlu0 %372  ;;  %v468_v21 = vadd.f32 %v964_v30, %v445_v10  ;;  %v751_v47 = vld [vmem:[%s1011_s5 + $0x8] sm:$0xff]  }
 0x10c   :  { %v444_v15 = vmul.f32 %v383_v59, %v332_v6  ;;  %v442_v24 = vmul.f32 %v373_v11, %v330_v16  ;;  %v464_v38 = vadd.f32 %v964_v30, %v441_v31 }
 0x10d   :  { %v494_v46 = vmax.f32 %v478_v39, 0.0  ;;  %v476_v48 = vadd.f32 %v964_v30, %v453_v40  ;;  %v484_v33 = vmax.f32 %v468_v21, 0.0 }
 0x10e   :  { %v467_v26 = vadd.f32 %v964_v30, %v444_v15  ;;  %v465_v34 = vadd.f32 %v964_v30, %v442_v24  ;;  %v480_v42 = vmax.f32 %v464_v38, 0.0 }
 0x10f   :  { %v502_v50 = vpack.c.bf16 %v494_v46, %v493_v45  ;;  %v492_v51 = vmax.f32 %v476_v48, 0.0  ;;  %v363_v27 = vpop.permute.xlu0 %362  ;;  %v503_v46 = vld [vmem:[%s1010_s4] sm:$0x3]  ;;  %s778_s4 = smov [#allocation3]  }
 0x110   :  { %v440_v35 = vmul.f32 %v363_v27, %v328_v28  ;;  %v483_v36 = vmax.f32 %v467_v26, 0.0  ;;  %v481_v40 = vmax.f32 %v465_v34, 0.0  ;;  %s611_s16 = sshll.u32 %s778_s4, 4  ;;  %s612_s16 = int_to_ptr.vmem [resolvable:$true] %s611_s16 }
 0x111   :  { %702 = vmatpush3.bf16.msra.mxu1 %v502_v50  ;;  %v501_v61 = vpack.c.bf16 %v492_v51, %v491_v56  ;;  %p758_p1 = scmp.lt.s32.totalorder %s612_s16, %s612_s16 }
 0x112   :  { %703 = vmatprep.subr.bf16.mxu1 %v776_v18  ;;  %v497_v39 = vpack.c.bf16 %v484_v33, %v483_v36  ;;  %v463_v41 = vadd.f32 %v964_v30, %v440_v35  ;;  %v496_v43 = vpack.c.bf16 %v482_v37, %v481_v40  ;;  %v752_v30 = vld [vmem:[%s1011_s5] sm:$0xff]   ;;  %s753_s5 = scalar_lea.vmem %s612_s16, 64 }
 0x113   :  { %p754_p0 = scmp.ne.s32.totalorder %s612_s16, %s753_s5  ;;  %p759_p2 = scmp.lt.s32.totalorder %s753_s5, %s753_s5 }
 0x114   :  { %v479_v44 = vmax.f32 %v463_v41, 0.0 }
 0x115   :  { %704 = vmatpush3.bf16.msra.mxu1 %v501_v61  ;;  %p760_p3 = por %p759_p2, %p758_p1 }
 0x116   :  { %705 = vmatprep.subr.bf16.mxu1 %v776_v18  ;;  %v495_v45 = vpack.c.bf16 %v480_v42, %v479_v44 }
 0x117   :  { %p761_p4 = pnand %p760_p3, %p754_p0 }
 0x119   :  { %706 = vmatpush3.bf16.msra.mxu1 %v500_v7 }
 0x11a   :  { %707 = vmatprep.subr.bf16.mxu1 %v776_v18 }
 0x11d   :  { %708 = vmatpush3.bf16.msra.mxu1 %v499_v19 }
 0x11e   :  { %709 = vmatprep.subr.bf16.mxu1 %v776_v18 }
 0x121   :  { %710 = vmatpush3.bf16.msra.mxu1 %v498_v32 }
 0x122   :  { %711 = vmatprep.subr.bf16.mxu1 %v776_v18 }
 0x125   :  { %712 = vmatpush3.bf16.msra.mxu1 %v497_v39 }
 0x126   :  { %713 = vmatprep.subr.bf16.mxu1 %v776_v18 }
 0x129   :  { %714 = vmatpush3.bf16.msra.mxu1 %v496_v43 }
 0x12a   :  { %715 = vmatprep.subr.bf16.mxu1 %v776_v18 }
 0x12d   :  { %716 = vmatpush3.bf16.msra.mxu1 %v495_v45 }
 0x12e   :  { %721 = vmatprep.subr.bf16.mxu1 %v776_v18 }
 0x130   :  { %718 = vmatmul.mubr.bf16.vlgmr.msra.gmra.mxu1 %v503_v46 }
 0x131   :  { %722 = vmatpush3.bf16.msra.mxu1 %v751_v47  ;;  %725 = vmatprep.mubr.msk.bf16.mxu1 %vm777_vm1, %v776_v18 }
 0x132   :  { %723 = vmatprep.subr.bf16.mxu1 %v776_v18 }
 0x135   :  { %724 = vmatpush3.bf16.msra.mxu1 %v752_v30 }
 0x1f0   :  { %v538_v48 = vpop.f32.mrf.mxu1 }
 0x1f1   :  { %v544_v49 = vpack.c.bf16 %v538_v48, %v538_v48 }
 0x1f2   :  { %v719_v50 = vpop.f32.mrf.mxu1 }
 0x1f3   :  { %726 = vmatmul.mubr.msk.bf16.vlgmr.msra.gmra.mxu1 %vm29_vm0, %v544_v49 }
 0x1f4   :  { %v541_v51 = vpop.f32.mrf.mxu1 }
 0x1f6   :  { %v720_v52 = vpop.f32.mrf.mxu1 }
 0x2b3   :  { %v598_v53 = vpop.f32.mrf.mxu1 }
 0x2b4   :  { %604 = vst [vmem:[#allocation3] sm:$0xf] %v598_v53 }
 0x2b5   :  { %v727_v54 = vpop.f32.mrf.mxu1 }
 0x2b6   :  { %764 = shalt.err (!%p761_p4)
}
 0x2b7   :  { %614 = dma.vmem_to_hbm [thread:$0]  %s612_s16, 64, %s1012_s6, [#allocation4]   ;;  %v601_v18 = vpop.f32.mrf.mxu1 }
 0x2b9   :  { %v728_v55 = vpop.f32.mrf.mxu1 }
 0x2ba   :  { %773 = dma.done.wait [#allocation4], 64  }
 0x2bb   :  { %774 = vsyncadd [#allocation4], 4294967232 }
 0x2bc   :  { %618 = vsyncpa [#allocation4], 1 }

</bundles_post_ra>
